<compile_context>
chip_gen: v7x
topology: tpu7x:2x2x1
jax: 0.10.0
libtpu: 0.0.40
codegen_flags: <defaults>
</compile_context>

<pallas_src>
import jax
import jax.numpy as jnp
from jax import lax
from jax.experimental import pallas as pl
from jax.experimental.pallas import tpu as pltpu

BN_EPS = 1e-5
TILE_M = 256      # rows per grid step (>=256 per measured tile-size sweep)
LANES = 128       # channel padding target (lane-dense stores / MXU panel)


def _round_up(x, m):
    return (x + m - 1) // m * m


# ----------------------------- Pallas kernels ------------------------------ #

def _matmul_stats_kernel(p_ref, w_ref, y_ref, stats_ref):
    """Pass 1: y = patches @ w (bf16 operands, f32 MXU accumulation) for one
    M-tile, plus accumulation of per-channel sum (row 0) and sumsq (row 1)."""
    @pl.when(pl.program_id(0) == 0)
    def _init():
        stats_ref[...] = jnp.zeros_like(stats_ref)

    y = jnp.dot(p_ref[...], w_ref[...], preferred_element_type=jnp.float32)
    y_ref[...] = y
    stats_ref[0:1, :] += jnp.sum(y, axis=0, keepdims=True)
    stats_ref[1:2, :] += jnp.sum(y * y, axis=0, keepdims=True)


def _bn_relu_kernel(y_ref, scale_ref, shift_ref, o_ref):
    """Pass 2 (no residual): out = max(y*scale + shift, 0)."""
    o_ref[...] = jnp.maximum(y_ref[...] * scale_ref[...] + shift_ref[...], 0.0)


def _bn_add_relu_kernel(y_ref, res_ref, scale_ref, shift_ref, o_ref):
    """Pass 2 (identity residual): out = max(y*scale + shift + res, 0)."""
    o_ref[...] = jnp.maximum(
        y_ref[...] * scale_ref[...] + shift_ref[...] + res_ref[...], 0.0)


# ------------------------------ glue / wrapper ------------------------------ #

def _im2col_nhwc(x_nhwc, kh, kw, stride, padding):
    """[N,H,W,C] -> patches [N*OH*OW, kh*kw*C] (feature order (ki, kj, c))."""
    N, H, W, C = x_nhwc.shape
    OH = (H + 2 * padding - kh) // stride + 1
    OW = (W + 2 * padding - kw) // stride + 1
    xp = jnp.pad(x_nhwc, ((0, 0), (padding, padding), (padding, padding), (0, 0)))
    pieces = []
    for ki in range(kh):
        for kj in range(kw):
            pieces.append(xp[:, ki:ki + (OH - 1) * stride + 1:stride,
                             kj:kj + (OW - 1) * stride + 1:stride, :])
    patches = jnp.stack(pieces, axis=3)              # [N, OH, OW, kh*kw, C]
    return patches.reshape(N * OH * OW, kh * kw * C), OH, OW


def _conv3x3_bn_relu(x_nhwc, w_oihw, gamma, beta, stride=1, residual_2d=None,
                     tm=TILE_M):
    """conv3x3(pad=1, bias=False) + BatchNorm2d(batch stats) [+res] + ReLU.

    x_nhwc: [N,H,W,Cin] f32; w_oihw: [Cout,Cin,3,3]; residual_2d: optional
    [N*OH*OW, Cout] f32 identity shortcut. Returns [N,OH,OW,Cout] f32.
    """
    N, H, W, Cin = x_nhwc.shape
    Cout, _, kh, kw = w_oihw.shape

    patches, OH, OW = _im2col_nhwc(x_nhwc, kh, kw, stride, 1)
    M, K = patches.shape
    M_pad = _round_up(M, tm)
    Cp = _round_up(Cout, LANES)
    grid_m = M_pad // tm

    # bf16 MXU operands (f32 accumulation inside the kernel).
    patches = jnp.pad(patches, ((0, M_pad - M), (0, 0))).astype(jnp.bfloat16)
    # OIHW -> (kh, kw, Cin, Cout) -> [K, Cout]; zero-pad channels to Cp.
    w_mat = jnp.transpose(w_oihw, (2, 3, 1, 0)).reshape(K, Cout)
    w_mat = jnp.pad(w_mat, ((0, 0), (0, Cp - Cout))).astype(jnp.bfloat16)

    # ---- pass 1: tiled matmul + per-channel sum / sumsq accumulation ------- #
    y, stats = pl.pallas_call(
        _matmul_stats_kernel,
        out_shape=(jax.ShapeDtypeStruct((M_pad, Cp), jnp.float32),
                   jax.ShapeDtypeStruct((8, Cp), jnp.float32)),
        grid=(grid_m,),
        in_specs=[
            pl.BlockSpec((tm, K), lambda i: (i, 0)),
            pl.BlockSpec((K, Cp), lambda i: (0, 0)),
        ],
        out_specs=(
            pl.BlockSpec((tm, Cp), lambda i: (i, 0)),
            pl.BlockSpec((8, Cp), lambda i: (0, 0)),   # resident accumulator
        ),
        compiler_params=pltpu.CompilerParams(
            dimension_semantics=("arbitrary",)),
    )(patches, w_mat)

    # ---- fold BN into one per-channel FMA (tiny [Cp] math in the wrapper) -- #
    mean = stats[0] / M
    var = jnp.maximum(stats[1] / M - mean * mean, 0.0)   # biased batch variance
    gamma_p = jnp.pad(gamma.astype(jnp.float32), (0, Cp - Cout))
    beta_p = jnp.pad(beta.astype(jnp.float32), (0, Cp - Cout))
    inv = lax.rsqrt(var + BN_EPS)
    scale = (gamma_p * inv).reshape(1, Cp)
    shift = (beta_p - mean * gamma_p * inv).reshape(1, Cp)

    # ---- pass 2: fused scale/shift (+ residual) + ReLU, lane-dense stores -- #
    common = dict(
        out_shape=jax.ShapeDtypeStruct((M_pad, Cp), jnp.float32),
        grid=(grid_m,),
        out_specs=pl.BlockSpec((tm, Cp), lambda i: (i, 0)),
        compiler_params=pltpu.CompilerParams(
            dimension_semantics=("parallel",)),
    )
    if residual_2d is None:
        out2d = pl.pallas_call(
            _bn_relu_kernel,
            in_specs=[
                pl.BlockSpec((tm, Cp), lambda i: (i, 0)),
                pl.BlockSpec((1, Cp), lambda i: (0, 0)),
                pl.BlockSpec((1, Cp), lambda i: (0, 0)),
            ],
            **common,
        )(y, scale, shift)
    else:
        res = jnp.pad(residual_2d.astype(jnp.float32),
                      ((0, M_pad - M), (0, Cp - Cout)))
        out2d = pl.pallas_call(
            _bn_add_relu_kernel,
            in_specs=[
                pl.BlockSpec((tm, Cp), lambda i: (i, 0)),
                pl.BlockSpec((tm, Cp), lambda i: (i, 0)),
                pl.BlockSpec((1, Cp), lambda i: (0, 0)),
                pl.BlockSpec((1, Cp), lambda i: (0, 0)),
            ],
            **common,
        )(y, res, scale, shift)

    return out2d[:M, :Cout].reshape(N, OH, OW, Cout)


def basic_block(x, w1, gamma1, beta1, w2, gamma2, beta2, stride=1):
    """BasicBlock forward (downsample=None): NCHW in, NCHW out."""
    N, Cin, H, W = x.shape
    planes = w1.shape[0]
    if stride != 1 or Cin != planes:
        raise NotImplementedError(
            "identity residual requires stride=1 and inplanes==planes")

    x_nhwc = jnp.transpose(x, (0, 2, 3, 1)).astype(jnp.float32)

    # conv1 -> bn1 -> relu
    h = _conv3x3_bn_relu(x_nhwc, w1, gamma1, beta1, stride=stride)
    # conv2 -> bn2 -> (+ x) -> relu
    res2d = x_nhwc.reshape(N * H * W, Cin)
    out_nhwc = _conv3x3_bn_relu(h, w2, gamma2, beta2, stride=1,
                                residual_2d=res2d)
    return jnp.transpose(out_nhwc, (0, 3, 1, 2))


# --------------------------------- reference -------------------------------- #

def _rbf16(a):
    """Round to bf16 and back (matches the kernel's bf16 MXU operands)."""
    return a.astype(jnp.bfloat16).astype(jnp.float32)


def _reference(x, w1, g1, b1, w2, g2, b2):
    def convbn(inp, w, g, b):
        y = lax.conv_general_dilated(
            _rbf16(inp), _rbf16(w), (1, 1), [(1, 1), (1, 1)],
            dimension_numbers=("NCHW", "OIHW", "NCHW"),
            preferred_element_type=jnp.float32)
        mean = jnp.mean(y, axis=(0, 2, 3), keepdims=True)
        var = jnp.mean((y - mean) ** 2, axis=(0, 2, 3), keepdims=True)
        scale = g.reshape(1, -1, 1, 1) * lax.rsqrt(var + BN_EPS)
        shift = b.reshape(1, -1, 1, 1) - mean * scale
        return y * scale + shift

    h = jnp.maximum(convbn(x, w1, g1, b1), 0.0)
    out = convbn(h, w2, g2, b2) + x
    return jnp.maximum(out, 0.0)


if __name__ == "__main__":
    # BasicBlock(inplanes=8, planes=8, stride=1, downsample=None) on [2,8,16,16].
    N, C, H, W = 2, 8, 16, 16
    planes = C

    key = jax.random.PRNGKey(0)
    kx, kw1, kw2, kg1, kb1, kg2, kb2 = jax.random.split(key, 7)

    x = jax.random.normal(kx, (N, C, H, W), dtype=jnp.float32)
    fan_in = C * 9
    bound = 1.0 / (fan_in ** 0.5)           # PyTorch Conv2d default init range
    w1 = jax.random.uniform(kw1, (planes, C, 3, 3), minval=-bound,
                            maxval=bound, dtype=jnp.float32)
    w2 = jax.random.uniform(kw2, (planes, planes, 3, 3), minval=-bound,
                            maxval=bound, dtype=jnp.float32)
    # BatchNorm affine params (randomized to exercise the affine path).
    gamma1 = 1.0 + 0.1 * jax.random.normal(kg1, (planes,), dtype=jnp.float32)
    beta1 = 0.1 * jax.random.normal(kb1, (planes,), dtype=jnp.float32)
    gamma2 = 1.0 + 0.1 * jax.random.normal(kg2, (planes,), dtype=jnp.float32)
    beta2 = 0.1 * jax.random.normal(kb2, (planes,), dtype=jnp.float32)

    out = jax.jit(basic_block)(x, w1, gamma1, beta1, w2, gamma2, beta2)
    out = jax.block_until_ready(out)

    ref = _reference(x, w1, gamma1, beta1, w2, gamma2, beta2)
    assert out.shape == (N, planes, H, W)
    max_err = float(jnp.max(jnp.abs(out - ref)))
    assert jnp.allclose(out, ref, rtol=1e-2, atol=1e-2), max_err

    print("KERNEL_OK")
</pallas_src>

<mosaic_0001>
module attributes {stable_mosaic.version = 11 : i64} {
  func.func @_matmul_stats_kernel(%arg0: i32, %arg1: memref<256x72xbf16, #tpu.memory_space<vmem>>, %arg2: memref<72x128xbf16, #tpu.memory_space<vmem>>, %arg3: memref<256x128xf32, #tpu.memory_space<vmem>>, %arg4: memref<8x128xf32, #tpu.memory_space<vmem>>) attributes {dimension_semantics = [#tpu.dimension_semantics<arbitrary>], iteration_bounds = array<i64: 2>, scalar_prefetch = 0 : i64, scratch_operands = 0 : i64, tpu.core_type = #tpu.core_type<tc>, window_params = [{transform_indices = @transform_0, window_bounds = array<i64: 256, 72>}, {pipeline_mode = #tpu.pipeline_mode<synchronous>, transform_indices = @transform_1, window_bounds = array<i64: 72, 128>}, {transform_indices = @transform_2, window_bounds = array<i64: 256, 128>}, {pipeline_mode = #tpu.pipeline_mode<synchronous>, transform_indices = @transform_3, window_bounds = array<i64: 8, 128>}]} {
    %c0_i32 = arith.constant 0 : i32
    %0 = arith.cmpi eq, %arg0, %c0_i32 : i32
    %1 = arith.extui %0 : i1 to i32
    %c0_i32_0 = arith.constant 0 : i32
    %2 = arith.cmpi ne, %1, %c0_i32_0 : i32
    scf.if %2 {
      %cst_15 = arith.constant 0.000000e+00 : f32
      %18 = vector.broadcast %cst_15 : f32 to vector<8x128xf32>
      %c0_16 = arith.constant 0 : index
      %c0_17 = arith.constant 0 : index
      %19 = vector.load %arg4[%c0_16, %c0_17] : memref<8x128xf32, #tpu.memory_space<vmem>>, vector<8x128xf32>
      tpu.vector_store %arg4[%c0_16, %c0_17], %18 {strides = array<i32>} : memref<8x128xf32, #tpu.memory_space<vmem>>, vector<8x128xf32>,
    } else {
    }
    %c0 = arith.constant 0 : index
    %c0_1 = arith.constant 0 : index
    %3 = vector.load %arg1[%c0, %c0_1] : memref<256x72xbf16, #tpu.memory_space<vmem>>, vector<256x72xbf16>
    %c0_2 = arith.constant 0 : index
    %c0_3 = arith.constant 0 : index
    %4 = vector.load %arg2[%c0_2, %c0_3] : memref<72x128xbf16, #tpu.memory_space<vmem>>, vector<72x128xbf16>
    %cst = arith.constant dense<0.000000e+00> : vector<256x128xf32>
    %5 = tpu.matmul %3, %4, %cst {dimension_numbers = #tpu.dot_dimension_numbers<[1], [0], [0], [1], [0, 0, 1, 1], [], []>} : vector<256x72xbf16>, vector<72x128xbf16>, vector<256x128xf32> -> vector<256x128xf32>
    %c0_4 = arith.constant 0 : index
    %c0_5 = arith.constant 0 : index
    %6 = vector.load %arg3[%c0_4, %c0_5] : memref<256x128xf32, #tpu.memory_space<vmem>>, vector<256x128xf32>
    tpu.vector_store %arg3[%c0_4, %c0_5], %5 {strides = array<i32>} : memref<256x128xf32, #tpu.memory_space<vmem>>, vector<256x128xf32>,
    %c0_6 = arith.constant 0 : index
    %c0_7 = arith.constant 0 : index
    %7 = vector.load %arg4[%c0_6, %c0_7] : memref<8x128xf32, #tpu.memory_space<vmem>>, vector<1x128xf32>
    %cst_8 = arith.constant dense<0.000000e+00> : vector<128xf32>
    %8 = vector.multi_reduction <add>, %5, %cst_8 [0] : vector<256x128xf32> to vector<128xf32>
    %9 = vector.shape_cast %8 : vector<128xf32> to vector<1x128xf32>
    %10 = arith.addf %7, %9 : vector<1x128xf32>
    %c0_9 = arith.constant 0 : index
    %c0_10 = arith.constant 0 : index
    %11 = vector.load %arg4[%c0_9, %c0_10] : memref<8x128xf32, #tpu.memory_space<vmem>>, vector<1x128xf32>
    tpu.vector_store %arg4[%c0_9, %c0_10], %10 {strides = array<i32>} : memref<8x128xf32, #tpu.memory_space<vmem>>, vector<1x128xf32>,
    %c1 = arith.constant 1 : index
    %c0_11 = arith.constant 0 : index
    %12 = vector.load %arg4[%c1, %c0_11] : memref<8x128xf32, #tpu.memory_space<vmem>>, vector<1x128xf32>
    %13 = arith.mulf %5, %5 : vector<256x128xf32>
    %cst_12 = arith.constant dense<0.000000e+00> : vector<128xf32>
    %14 = vector.multi_reduction <add>, %13, %cst_12 [0] : vector<256x128xf32> to vector<128xf32>
    %15 = vector.shape_cast %14 : vector<128xf32> to vector<1x128xf32>
    %16 = arith.addf %12, %15 : vector<1x128xf32>
    %c1_13 = arith.constant 1 : index
    %c0_14 = arith.constant 0 : index
    %17 = vector.load %arg4[%c1_13, %c0_14] : memref<8x128xf32, #tpu.memory_space<vmem>>, vector<1x128xf32>
    tpu.vector_store %arg4[%c1_13, %c0_14], %16 {strides = array<i32>} : memref<8x128xf32, #tpu.memory_space<vmem>>, vector<1x128xf32>,
    return
  }
  func.func @transform_0(%arg0: i32) -> (i32, i32) {
    %c0_i32 = arith.constant 0 : i32
    %c0_i32_0 = arith.constant 0 : i32
    return %arg0, %c0_i32 : i32, i32
  }
  func.func @transform_1(%arg0: i32) -> (i32, i32) {
    %c0_i32 = arith.constant 0 : i32
    %c0_i32_0 = arith.constant 0 : i32
    %c0_i32_1 = arith.constant 0 : i32
    return %c0_i32, %c0_i32_0 : i32, i32
  }
  func.func @transform_2(%arg0: i32) -> (i32, i32) {
    %c0_i32 = arith.constant 0 : i32
    %c0_i32_0 = arith.constant 0 : i32
    return %arg0, %c0_i32 : i32, i32
  }
  func.func @transform_3(%arg0: i32) -> (i32, i32) {
    %c0_i32 = arith.constant 0 : i32
    %c0_i32_0 = arith.constant 0 : i32
    %c0_i32_1 = arith.constant 0 : i32
    return %c0_i32, %c0_i32_0 : i32, i32
  }
}

module attributes {stable_mosaic.version = 11 : i64} {
  func.func @_bn_relu_kernel(%arg0: i32, %arg1: memref<256x128xf32, #tpu.memory_space<vmem>>, %arg2: memref<1x128xf32, #tpu.memory_space<vmem>>, %arg3: memref<1x128xf32, #tpu.memory_space<vmem>>, %arg4: memref<256x128xf32, #tpu.memory_space<vmem>>) attributes {dimension_semantics = [#tpu.dimension_semantics<parallel>], iteration_bounds = array<i64: 2>, scalar_prefetch = 0 : i64, scratch_operands = 0 : i64, tpu.core_type = #tpu.core_type<tc>, window_params = [{transform_indices = @transform_0, window_bounds = array<i64: 256, 128>}, {pipeline_mode = #tpu.pipeline_mode<synchronous>, transform_indices = @transform_1, window_bounds = array<i64: 1, 128>}, {pipeline_mode = #tpu.pipeline_mode<synchronous>, transform_indices = @transform_2, window_bounds = array<i64: 1, 128>}, {transform_indices = @transform_3, window_bounds = array<i64: 256, 128>}]} {
    %c0 = arith.constant 0 : index
    %c0_0 = arith.constant 0 : index
    %0 = vector.load %arg1[%c0, %c0_0] : memref<256x128xf32, #tpu.memory_space<vmem>>, vector<256x128xf32>
    %c0_1 = arith.constant 0 : index
    %c0_2 = arith.constant 0 : index
    %1 = vector.load %arg2[%c0_1, %c0_2] : memref<1x128xf32, #tpu.memory_space<vmem>>, vector<1x128xf32>
    %2 = vector.broadcast %1 : vector<1x128xf32> to vector<256x128xf32>
    %3 = arith.mulf %0, %2 : vector<256x128xf32>
    %c0_3 = arith.constant 0 : index
    %c0_4 = arith.constant 0 : index
    %4 = vector.load %arg3[%c0_3, %c0_4] : memref<1x128xf32, #tpu.memory_space<vmem>>, vector<1x128xf32>
    %5 = vector.broadcast %4 : vector<1x128xf32> to vector<256x128xf32>
    %6 = arith.addf %3, %5 : vector<256x128xf32>
    %cst = arith.constant 0.000000e+00 : f32
    %7 = vector.broadcast %cst : f32 to vector<256x128xf32>
    %8 = arith.maximumf %6, %7 : vector<256x128xf32>
    %c0_5 = arith.constant 0 : index
    %c0_6 = arith.constant 0 : index
    %9 = vector.load %arg4[%c0_5, %c0_6] : memref<256x128xf32, #tpu.memory_space<vmem>>, vector<256x128xf32>
    tpu.vector_store %arg4[%c0_5, %c0_6], %8 {strides = array<i32>} : memref<256x128xf32, #tpu.memory_space<vmem>>, vector<256x128xf32>,
    return
  }
  func.func @transform_0(%arg0: i32) -> (i32, i32) {
    %c0_i32 = arith.constant 0 : i32
    %c0_i32_0 = arith.constant 0 : i32
    return %arg0, %c0_i32 : i32, i32
  }
  func.func @transform_1(%arg0: i32) -> (i32, i32) {
    %c0_i32 = arith.constant 0 : i32
    %c0_i32_0 = arith.constant 0 : i32
    %c0_i32_1 = arith.constant 0 : i32
    return %c0_i32, %c0_i32_0 : i32, i32
  }
  func.func @transform_2(%arg0: i32) -> (i32, i32) {
    %c0_i32 = arith.constant 0 : i32
    %c0_i32_0 = arith.constant 0 : i32
    %c0_i32_1 = arith.constant 0 : i32
    return %c0_i32, %c0_i32_0 : i32, i32
  }
  func.func @transform_3(%arg0: i32) -> (i32, i32) {
    %c0_i32 = arith.constant 0 : i32
    %c0_i32_0 = arith.constant 0 : i32
    return %arg0, %c0_i32 : i32, i32
  }
}

module attributes {stable_mosaic.version = 11 : i64} {
  func.func @_bn_add_relu_kernel(%arg0: i32, %arg1: memref<256x128xf32, #tpu.memory_space<vmem>>, %arg2: memref<256x128xf32, #tpu.memory_space<vmem>>, %arg3: memref<1x128xf32, #tpu.memory_space<vmem>>, %arg4: memref<1x128xf32, #tpu.memory_space<vmem>>, %arg5: memref<256x128xf32, #tpu.memory_space<vmem>>) attributes {dimension_semantics = [#tpu.dimension_semantics<parallel>], iteration_bounds = array<i64: 2>, scalar_prefetch = 0 : i64, scratch_operands = 0 : i64, tpu.core_type = #tpu.core_type<tc>, window_params = [{transform_indices = @transform_0, window_bounds = array<i64: 256, 128>}, {transform_indices = @transform_1, window_bounds = array<i64: 256, 128>}, {pipeline_mode = #tpu.pipeline_mode<synchronous>, transform_indices = @transform_2, window_bounds = array<i64: 1, 128>}, {pipeline_mode = #tpu.pipeline_mode<synchronous>, transform_indices = @transform_3, window_bounds = array<i64: 1, 128>}, {transform_indices = @transform_4, window_bounds = array<i64: 256, 128>}]} {
    %c0 = arith.constant 0 : index
    %c0_0 = arith.constant 0 : index
    %0 = vector.load %arg1[%c0, %c0_0] : memref<256x128xf32, #tpu.memory_space<vmem>>, vector<256x128xf32>
    %c0_1 = arith.constant 0 : index
    %c0_2 = arith.constant 0 : index
    %1 = vector.load %arg3[%c0_1, %c0_2] : memref<1x128xf32, #tpu.memory_space<vmem>>, vector<1x128xf32>
    %2 = vector.broadcast %1 : vector<1x128xf32> to vector<256x128xf32>
    %3 = arith.mulf %0, %2 : vector<256x128xf32>
    %c0_3 = arith.constant 0 : index
    %c0_4 = arith.constant 0 : index
    %4 = vector.load %arg4[%c0_3, %c0_4] : memref<1x128xf32, #tpu.memory_space<vmem>>, vector<1x128xf32>
    %5 = vector.broadcast %4 : vector<1x128xf32> to vector<256x128xf32>
    %6 = arith.addf %3, %5 : vector<256x128xf32>
    %c0_5 = arith.constant 0 : index
    %c0_6 = arith.constant 0 : index
    %7 = vector.load %arg2[%c0_5, %c0_6] : memref<256x128xf32, #tpu.memory_space<vmem>>, vector<256x128xf32>
    %8 = arith.addf %6, %7 : vector<256x128xf32>
    %cst = arith.constant 0.000000e+00 : f32
    %9 = vector.broadcast %cst : f32 to vector<256x128xf32>
    %10 = arith.maximumf %8, %9 : vector<256x128xf32>
    %c0_7 = arith.constant 0 : index
    %c0_8 = arith.constant 0 : index
    %11 = vector.load %arg5[%c0_7, %c0_8] : memref<256x128xf32, #tpu.memory_space<vmem>>, vector<256x128xf32>
    tpu.vector_store %arg5[%c0_7, %c0_8], %10 {strides = array<i32>} : memref<256x128xf32, #tpu.memory_space<vmem>>, vector<256x128xf32>,
    return
  }
  func.func @transform_0(%arg0: i32) -> (i32, i32) {
    %c0_i32 = arith.constant 0 : i32
    %c0_i32_0 = arith.constant 0 : i32
    return %arg0, %c0_i32 : i32, i32
  }
  func.func @transform_1(%arg0: i32) -> (i32, i32) {
    %c0_i32 = arith.constant 0 : i32
    %c0_i32_0 = arith.constant 0 : i32
    return %arg0, %c0_i32 : i32, i32
  }
  func.func @transform_2(%arg0: i32) -> (i32, i32) {
    %c0_i32 = arith.constant 0 : i32
    %c0_i32_0 = arith.constant 0 : i32
    %c0_i32_1 = arith.constant 0 : i32
    return %c0_i32, %c0_i32_0 : i32, i32
  }
  func.func @transform_3(%arg0: i32) -> (i32, i32) {
    %c0_i32 = arith.constant 0 : i32
    %c0_i32_0 = arith.constant 0 : i32
    %c0_i32_1 = arith.constant 0 : i32
    return %c0_i32, %c0_i32_0 : i32, i32
  }
  func.func @transform_4(%arg0: i32) -> (i32, i32) {
    %c0_i32 = arith.constant 0 : i32
    %c0_i32_0 = arith.constant 0 : i32
    return %arg0, %c0_i32 : i32, i32
  }
}

</mosaic_0001>

<bundles_post_ra>
// kernel: basic_block.5
= control target key start
LH: loop header
LB: loop body
LE: loop exit
PB: predicated region body
PF: predicated region fallthrough
CT: control target
= control target key end

     0   :  { %s453_s12 = smov 0   ;;  %s612_s0 = inlined_call_operand.vmem [shape: f32[512,128], index: 0, kind: input, shape index: {}]   ;;  %s613_s1 = inlined_call_operand.vmem [shape: f32[1,128], index: 1, kind: input, shape index: {}]   ;;  %s614_s2 = inlined_call_operand.vmem [shape: f32[1,128], index: 2, kind: input, shape index: {}]   ;;  %s615_s3 = inlined_call_operand.vmem [shape: f32[512,128], index: 3, kind: output, shape index: {}]  }
   0x1 LB: > { %s404_s13 = sadd.s32 4294967295, %s431_s12   ;;  %p408_p0 = scmp.ge.s32.totalorder %s431_s12, 1  ;;  %s431_s12 = sphi %s453_s12, %s13_s12  }
   0x2   : > { %p138_p1 = scmp.lt.s32.totalorder %s431_s12, 3 }
   0x4   : > { %p139_p2 = pnand %p408_p0, %p138_p1 }
   0x5   : > { %s409_s14 = sshll.u32 (!%p139_p2), %s404_s13, 5  ;;  %v464_v0 = vld [vmem:[%s613_s1] ss:$0 sm:$0xff] (!%p139_p2) }
   0x6   : > { %142 = sbr.rel (%p139_p2) target bundleno = 46 (0x2e), region = 32  ;;  %p163_p3 = scmp.lt.s32.totalorder (!%p139_p2), %s409_s14, 63  ;;  %v474_v1 = vld [vmem:[%s614_s2] ss:$0 sm:$0xff] (!%p139_p2) }
   0xd   : > { %s617_s14 = smov (!%p163_p3, %s409_s14), 63 }
   0xe   : > { %s410_s15 = sshll.u32 %s617_s14, 3 }
   0xf   : > { %s469_s20 = scalar_lea.vmem %s612_s0, %s410_s15  ;;  %s497_s25 = scalar_lea.vmem %s615_s3, %s410_s15 }
  0x10   : > { %v174_v2 = vld [vmem:[%s469_s20] sm:$0xff]  ;;  %v175_v3 = vld [vmem:[%s469_s20 + $0x8] sm:$0xff]  ;;  %v176_v4 = vld [vmem:[%s469_s20 + $0x10] sm:$0xff] }
  0x11   : > { %v213_v5 = vmul.f32 %v464_v0, %v174_v2  ;;  %v214_v6 = vmul.f32 %v464_v0, %v175_v3  ;;  %v215_v7 = vmul.f32 %v464_v0, %v176_v4  ;;  %v177_v8 = vld [vmem:[%s469_s20 + $0x18] sm:$0xff]  ;;  %v178_v9 = vld [vmem:[%s469_s20 + $0x20] sm:$0xff]  ;;  %v179_v10 = vld [vmem:[%s469_s20 + $0x28] sm:$0xff] }
  0x12   : > { %v216_v11 = vmul.f32 %v464_v0, %v177_v8  ;;  %v217_v12 = vmul.f32 %v464_v0, %v178_v9  ;;  %v218_v13 = vmul.f32 %v464_v0, %v179_v10  ;;  %v180_v14 = vld [vmem:[%s469_s20 + $0x30] sm:$0xff]  ;;  %v181_v15 = vld [vmem:[%s469_s20 + $0x38] sm:$0xff]  ;;  %v182_v24 = vld [vmem:[%s469_s20 + $0x40] sm:$0xff] }
  0x13   : > { %v252_v16 = vadd.f32 %v474_v1, %v213_v5  ;;  %v253_v17 = vadd.f32 %v474_v1, %v214_v6  ;;  %v254_v18 = vadd.f32 %v474_v1, %v215_v7  ;;  %v219_v19 = vmul.f32 %v464_v0, %v180_v14  ;;  %v183_v25 = vld [vmem:[%s469_s20 + $0x48] sm:$0xff]  ;;  %v184_v26 = vld [vmem:[%s469_s20 + $0x50] sm:$0xff]  ;;  %v185_v31 = vld [vmem:[%s469_s20 + $0x58] sm:$0xff] }
  0x14   : > { %v255_v20 = vadd.f32 %v474_v1, %v216_v11  ;;  %v256_v21 = vadd.f32 %v474_v1, %v217_v12  ;;  %v257_v22 = vadd.f32 %v474_v1, %v218_v13  ;;  %v220_v23 = vmul.f32 %v464_v0, %v181_v15  ;;  %v186_v32 = vld [vmem:[%s469_s20 + $0x60] sm:$0xff]  ;;  %v187_v33 = vld [vmem:[%s469_s20 + $0x68] sm:$0xff]  ;;  %v188_v38 = vld [vmem:[%s469_s20 + $0x70] sm:$0xff] }
  0x15   : > { %v284_v27 = vmax.f32 %v252_v16, 0.0  ;;  %v285_v28 = vmax.f32 %v253_v17, 0.0  ;;  %v286_v29 = vmax.f32 %v254_v18, 0.0  ;;  %v258_v30 = vadd.f32 %v474_v1, %v219_v19  ;;  %v189_v43 = vld [vmem:[%s469_s20 + $0x78] sm:$0xff]  ;;  %v190_v56 = vld [vmem:[%s469_s20 + $0x80] sm:$0xff]  ;;  %v191_v57 = vld [vmem:[%s469_s20 + $0x88] sm:$0xff] }
  0x16   : > { %v287_v34 = vmax.f32 %v255_v20, 0.0  ;;  %v288_v35 = vmax.f32 %v256_v21, 0.0  ;;  %v289_v36 = vmax.f32 %v257_v22, 0.0  ;;  %v259_v37 = vadd.f32 %v474_v1, %v220_v23  ;;  %v192_v58 = vld [vmem:[%s469_s20 + $0x90] sm:$0xff]  ;;  %v193_v63 = vld [vmem:[%s469_s20 + $0x98] sm:$0xff]  ;;  %v194_v2 = vld [vmem:[%s469_s20 + $0xa0] sm:$0xff] }
  0x17   : > { %316 = vst [vmem:[%s497_s25] sm:$0xff] %v284_v27  ;;  %317 = vst [vmem:[%s497_s25 + $0x8] sm:$0xff] %v285_v28  ;;  %v290_v39 = vmax.f32 %v258_v30, 0.0  ;;  %v221_v40 = vmul.f32 %v464_v0, %v182_v24  ;;  %v222_v41 = vmul.f32 %v464_v0, %v183_v25  ;;  %v223_v42 = vmul.f32 %v464_v0, %v184_v26  ;;  %v195_v3 = vld [vmem:[%s469_s20 + $0xa8] sm:$0xff]  ;;  %v196_v8 = vld [vmem:[%s469_s20 + $0xb0] sm:$0xff] }
  0x18   : > { %318 = vst [vmem:[%s497_s25 + $0x10] sm:$0xff] %v286_v29  ;;  %319 = vst [vmem:[%s497_s25 + $0x18] sm:$0xff] %v287_v34  ;;  %v291_v44 = vmax.f32 %v259_v37, 0.0  ;;  %v224_v45 = vmul.f32 %v464_v0, %v185_v31  ;;  %v225_v46 = vmul.f32 %v464_v0, %v186_v32  ;;  %v226_v47 = vmul.f32 %v464_v0, %v187_v33  ;;  %v197_v13 = vld [vmem:[%s469_s20 + $0xb8] sm:$0xff]  ;;  %v198_v26 = vld [vmem:[%s469_s20 + $0xc0] sm:$0xff] }
  0x19   : > { %320 = vst [vmem:[%s497_s25 + $0x20] sm:$0xff] %v288_v35  ;;  %321 = vst [vmem:[%s497_s25 + $0x28] sm:$0xff] %v289_v36  ;;  %v260_v48 = vadd.f32 %v474_v1, %v221_v40  ;;  %v261_v49 = vadd.f32 %v474_v1, %v222_v41  ;;  %v262_v50 = vadd.f32 %v474_v1, %v223_v42  ;;  %v199_v27 = vld [vmem:[%s469_s20 + $0xc8] sm:$0xff]  ;;  %v200_v28 = vld [vmem:[%s469_s20 + $0xd0] sm:$0xff] }
  0x1a   : > { %322 = vst [vmem:[%s497_s25 + $0x30] sm:$0xff] %v290_v39  ;;  %v227_v51 = vmul.f32 %v464_v0, %v188_v38  ;;  %323 = vst [vmem:[%s497_s25 + $0x38] sm:$0xff] %v291_v44  ;;  %v263_v52 = vadd.f32 %v474_v1, %v224_v45  ;;  %v264_v53 = vadd.f32 %v474_v1, %v225_v46  ;;  %v201_v33 = vld [vmem:[%s469_s20 + $0xd8] sm:$0xff]  ;;  %v202_v34 = vld [vmem:[%s469_s20 + $0xe0] sm:$0xff] }
  0x1b   : > { %v265_v54 = vadd.f32 %v474_v1, %v226_v47  ;;  %v228_v55 = vmul.f32 %v464_v0, %v189_v43  ;;  %v292_v59 = vmax.f32 %v260_v48, 0.0  ;;  %v293_v60 = vmax.f32 %v261_v49, 0.0  ;;  %v203_v35 = vld [vmem:[%s469_s20 + $0xe8] sm:$0xff]  ;;  %v204_v40 = vld [vmem:[%s469_s20 + $0xf0] sm:$0xff]  ;;  %v205_v45 = vld [vmem:[%s469_s20 + $0xf8] sm:$0xff] }
  0x1c   : > { %v294_v61 = vmax.f32 %v262_v50, 0.0  ;;  %v266_v62 = vadd.f32 %v474_v1, %v227_v51  ;;  %v295_v4 = vmax.f32 %v263_v52, 0.0  ;;  %v296_v5 = vmax.f32 %v264_v53, 0.0 }
  0x1d   : > { %v297_v6 = vmax.f32 %v265_v54, 0.0  ;;  %v267_v7 = vadd.f32 %v474_v1, %v228_v55  ;;  %324 = vst [vmem:[%s497_s25 + $0x40] sm:$0xff] %v292_v59  ;;  %325 = vst [vmem:[%s497_s25 + $0x48] sm:$0xff] %v293_v60  ;;  %v229_v10 = vmul.f32 %v464_v0, %v190_v56  ;;  %v230_v11 = vmul.f32 %v464_v0, %v191_v57 }
  0x1e   : > { %326 = vst [vmem:[%s497_s25 + $0x50] sm:$0xff] %v294_v61  ;;  %v298_v9 = vmax.f32 %v266_v62, 0.0  ;;  %v231_v12 = vmul.f32 %v464_v0, %v192_v58  ;;  %327 = vst [vmem:[%s497_s25 + $0x58] sm:$0xff] %v295_v4  ;;  %v232_v15 = vmul.f32 %v464_v0, %v193_v63  ;;  %v233_v16 = vmul.f32 %v464_v0, %v194_v2 }
  0x1f   : > { %328 = vst [vmem:[%s497_s25 + $0x60] sm:$0xff] %v296_v5  ;;  %329 = vst [vmem:[%s497_s25 + $0x68] sm:$0xff] %v297_v6  ;;  %v299_v14 = vmax.f32 %v267_v7, 0.0  ;;  %v234_v17 = vmul.f32 %v464_v0, %v195_v3  ;;  %v268_v18 = vadd.f32 %v474_v1, %v229_v10  ;;  %v269_v19 = vadd.f32 %v474_v1, %v230_v11 }
  0x20   : > { %330 = vst [vmem:[%s497_s25 + $0x70] sm:$0xff] %v298_v9  ;;  %v270_v20 = vadd.f32 %v474_v1, %v231_v12  ;;  %v235_v21 = vmul.f32 %v464_v0, %v196_v8  ;;  %v271_v22 = vadd.f32 %v474_v1, %v232_v15  ;;  %v272_v23 = vadd.f32 %v474_v1, %v233_v16 }
  0x21   : > { %331 = vst [vmem:[%s497_s25 + $0x78] sm:$0xff] %v299_v14  ;;  %v273_v24 = vadd.f32 %v474_v1, %v234_v17  ;;  %v236_v25 = vmul.f32 %v464_v0, %v197_v13  ;;  %v300_v29 = vmax.f32 %v268_v18, 0.0  ;;  %v301_v30 = vmax.f32 %v269_v19, 0.0 }
  0x22   : > { %v302_v31 = vmax.f32 %v270_v20, 0.0  ;;  %v274_v32 = vadd.f32 %v474_v1, %v235_v21  ;;  %v303_v36 = vmax.f32 %v271_v22, 0.0  ;;  %v304_v37 = vmax.f32 %v272_v23, 0.0 }
  0x23   : > { %v305_v38 = vmax.f32 %v273_v24, 0.0  ;;  %v275_v39 = vadd.f32 %v474_v1, %v236_v25  ;;  %332 = vst [vmem:[%s497_s25 + $0x80] sm:$0xff] %v300_v29  ;;  %333 = vst [vmem:[%s497_s25 + $0x88] sm:$0xff] %v301_v30  ;;  %v237_v42 = vmul.f32 %v464_v0, %v198_v26  ;;  %v238_v43 = vmul.f32 %v464_v0, %v199_v27 }
  0x24   : > { %334 = vst [vmem:[%s497_s25 + $0x90] sm:$0xff] %v302_v31  ;;  %v306_v41 = vmax.f32 %v274_v32, 0.0  ;;  %v239_v44 = vmul.f32 %v464_v0, %v200_v28  ;;  %335 = vst [vmem:[%s497_s25 + $0x98] sm:$0xff] %v303_v36  ;;  %v240_v47 = vmul.f32 %v464_v0, %v201_v33  ;;  %v241_v48 = vmul.f32 %v464_v0, %v202_v34 }
  0x25   : > { %336 = vst [vmem:[%s497_s25 + $0xa0] sm:$0xff] %v304_v37  ;;  %337 = vst [vmem:[%s497_s25 + $0xa8] sm:$0xff] %v305_v38  ;;  %v307_v46 = vmax.f32 %v275_v39, 0.0  ;;  %v242_v49 = vmul.f32 %v464_v0, %v203_v35  ;;  %v276_v50 = vadd.f32 %v474_v1, %v237_v42  ;;  %v277_v51 = vadd.f32 %v474_v1, %v238_v43 }
  0x26   : > { %338 = vst [vmem:[%s497_s25 + $0xb0] sm:$0xff] %v306_v41  ;;  %v278_v52 = vadd.f32 %v474_v1, %v239_v44  ;;  %v243_v53 = vmul.f32 %v464_v0, %v204_v40  ;;  %v279_v54 = vadd.f32 %v474_v1, %v240_v47  ;;  %v280_v55 = vadd.f32 %v474_v1, %v241_v48 }
  0x27   : > { %339 = vst [vmem:[%s497_s25 + $0xb8] sm:$0xff] %v307_v46  ;;  %v281_v56 = vadd.f32 %v474_v1, %v242_v49  ;;  %v244_v57 = vmul.f32 %v464_v0, %v205_v45  ;;  %v308_v58 = vmax.f32 %v276_v50, 0.0  ;;  %v309_v59 = vmax.f32 %v277_v51, 0.0 }
  0x28   : > { %v310_v60 = vmax.f32 %v278_v52, 0.0  ;;  %v282_v61 = vadd.f32 %v474_v1, %v243_v53  ;;  %v311_v62 = vmax.f32 %v279_v54, 0.0  ;;  %v312_v63 = vmax.f32 %v280_v55, 0.0 }
  0x29   : > { %v313_v2 = vmax.f32 %v281_v56, 0.0  ;;  %v283_v3 = vadd.f32 %v474_v1, %v244_v57  ;;  %340 = vst [vmem:[%s497_s25 + $0xc0] sm:$0xff] %v308_v58  ;;  %341 = vst [vmem:[%s497_s25 + $0xc8] sm:$0xff] %v309_v59 }
  0x2a   : > { %342 = vst [vmem:[%s497_s25 + $0xd0] sm:$0xff] %v310_v60  ;;  %v314_v4 = vmax.f32 %v282_v61, 0.0  ;;  %343 = vst [vmem:[%s497_s25 + $0xd8] sm:$0xff] %v311_v62 }
  0x2b   : > { %344 = vst [vmem:[%s497_s25 + $0xe0] sm:$0xff] %v312_v63  ;;  %345 = vst [vmem:[%s497_s25 + $0xe8] sm:$0xff] %v313_v2  ;;  %v315_v0 = vmax.f32 %v283_v3, 0.0 }
  0x2c   : > { %346 = vst [vmem:[%s497_s25 + $0xf0] sm:$0xff] %v314_v4 }
  0x2d   : > { %347 = vst [vmem:[%s497_s25 + $0xf8] sm:$0xff] %v315_v0 }
  0x2e PF: > { %s13_s12 = sadd.s32 1, %s431_s12  }
  0x2f   : > { %p10_p4 = scmp.ge.s32.totalorder %s13_s12, 4  }
  0x31   :  { %12 = sbr.rel (!%p10_p4) target bundleno = 1 (0x1), region = 62 }

// kernel: basic_block.4
= control target key start
LH: loop header
LB: loop body
LE: loop exit
PB: predicated region body
PF: predicated region fallthrough
CT: control target
= control target key end

     0   :  { %s929_s12 = smov 0   ;;  %s1122_s0 = inlined_call_operand.vmem [shape: bf16[512,72], index: 0, kind: input, shape index: {}]   ;;  %s1123_s1 = inlined_call_operand.vmem [shape: bf16[72,128], index: 1, kind: input, shape index: {}]   ;;  %s1124_s2 = inlined_call_operand.vmem [shape: f32[512,128], index: 2, kind: output, shape index: {0}]   ;;  %s1125_s3 = inlined_call_operand.vmem [shape: f32[8,128], index: 3, kind: output, shape index: {1}]  }
   0x1 LB: > { %s746_s13 = sadd.s32 4294967295, %s906_s12   ;;  %p750_p0 = scmp.ge.s32.totalorder %s906_s12, 1  ;;  %s906_s12 = sphi %s929_s12, %s14_s12  }
   0x2   : > { %p136_p1 = scmp.lt.s32.totalorder %s906_s12, 3 }
   0x4   : > { %p137_p2 = pnand %p750_p0, %p136_p1 }
   0x5   : > { %s751_s14 = sshll.u32 (!%p137_p2), %s746_s13, 5  ;;  %p755_p4 = scmp.ne.s32.totalorder (!%p137_p2), %s746_s13, 0 }
   0x6   : > { %140 = sbr.rel (%p137_p2) target bundleno = 335 (0x14f), region = 28  ;;  %p161_p3 = scmp.lt.s32.totalorder (!%p137_p2), %s751_s14, 63 }
   0xd   : > { %s1127_s14 = smov (!%p161_p3, %s751_s14), 63  ;;  %176 = sbr.rel (%p755_p4) target bundleno = 20 (0x14), region = 32 }
   0xe   : > { %s752_s15 = sshll.u32 %s1127_s14, 2  ;;  %s754_s16 = sshll.u32 %s1127_s14, 3  ;;  %v908_v0 = vmov (!%p755_p4), 0.0  }
   0xf   : > { %s940_s19 = scalar_lea.vmem %s1122_s0, %s752_s15  ;;  %s945_s22 = scalar_lea.vmem %s1124_s2, %s754_s16  ;;  %177 = vst [vmem:[%s1125_s3] sm:$0xff] (!%p755_p4), %v908_v0 }
  0x14 PF: > { %v879_v1 = vld [vmem:[%s1123_s1] sm:$0xff]   ;;  %v880_v2 = vld [vmem:[%s1123_s1 + $0x8] sm:$0xff]   ;;  %v881_v3 = vld [vmem:[%s1123_s1 + $0x10] sm:$0xff]   ;;  %vm326_vm0 = vcmask 588800   ;;  %vm375_vm1 = vcmask 1043456  }
  0x15   : > { %816 = vmatprep.subr.bf16.mxu0 %v879_v1  ;;  %858 = vmatprep.subr.bf16.mxu1 %v879_v1  ;;  %v884_v4 = vld [vmem:[%s940_s19] sm:$0xff]   ;;  %v882_v5 = vld [vmem:[%s1123_s1 + $0x18] sm:$0xff]   ;;  %v885_v9 = vld [vmem:[%s940_s19 + $0x8] sm:$0xff]  }
  0x16   : > { %817 = vmatpush3.bf16.msra.mxu0 %v879_v1  ;;  %863 = vmatpush3.bf16.msra.mxu1 %v879_v1  ;;  %v883_v6 = vld [vmem:[%s1123_s1 + $0x20] ss:$0 sps:$4 sm:$0xff]   ;;  %v886_v10 = vld [vmem:[%s940_s19 + $0x10] sm:$0xff]   ;;  %v893_v11 = vld [vmem:[%s940_s19 + $0x48] sm:$0xff]  }
  0x17   : > { %818 = vmatprep.subr.bf16.mxu0 %v880_v2  ;;  %859 = vmatprep.subr.bf16.mxu1 %v880_v2  ;;  %v892_v7 = vld [vmem:[%s940_s19 + $0x40] sm:$0xff]   ;;  %v377_v8 = vsel %vm375_vm1, %v883_v6, 0  ;;  %v894_v12 = vld [vmem:[%s940_s19 + $0x50] sm:$0xff]   ;;  %v887_v13 = vld [vmem:[%s940_s19 + $0x18] sm:$0xff]  }
  0x18   : > { %826 = vmatprep.mubr.msk.bf16.mxu0 %vm326_vm0, %v884_v4  ;;  %842 = vmatprep.mubr.msk.bf16.mxu1 %vm326_vm0, %v892_v7  ;;  %v888_v14 = vld [vmem:[%s940_s19 + $0x20] sm:$0xff]   ;;  %v895_v15 = vld [vmem:[%s940_s19 + $0x58] sm:$0xff]   ;;  %v889_v17 = vld [vmem:[%s940_s19 + $0x28] sm:$0xff]  }
  0x19   : > { %v896_v16 = vld [vmem:[%s940_s19 + $0x60] sm:$0xff]   ;;  %v890_v18 = vld [vmem:[%s940_s19 + $0x30] sm:$0xff]   ;;  %v897_v19 = vld [vmem:[%s940_s19 + $0x68] sm:$0xff]  }
  0x1a   : > { %819 = vmatpush3.bf16.msra.mxu0 %v880_v2  ;;  %864 = vmatpush3.bf16.msra.mxu1 %v880_v2  ;;  %v898_v20 = vld [vmem:[%s940_s19 + $0x70] sm:$0xff]   ;;  %v891_v21 = vld [vmem:[%s940_s19 + $0x38] sm:$0xff]  }
  0x1b   : > { %820 = vmatprep.subr.bf16.mxu0 %v881_v3  ;;  %860 = vmatprep.subr.bf16.mxu1 %v881_v3  ;;  %v899_v22 = vld [vmem:[%s940_s19 + $0x78] sm:$0xff]  }
  0x1e   : > { %821 = vmatpush3.bf16.msra.mxu0 %v881_v3  ;;  %865 = vmatpush3.bf16.msra.mxu1 %v881_v3 }
  0x1f   : > { %822 = vmatprep.subr.bf16.mxu0 %v882_v5  ;;  %861 = vmatprep.subr.bf16.mxu1 %v882_v5 }
  0x22   : > { %823 = vmatpush3.bf16.msra.mxu0 %v882_v5  ;;  %866 = vmatpush3.bf16.msra.mxu1 %v882_v5 }
  0x23   : > { %868 = vmatprep.subr.msk.bf16.mxu0 %vm375_vm1, %v883_v6  ;;  %869 = vmatprep.subr.msk.bf16.mxu1 %vm375_vm1, %v883_v6 }
  0x26   : > { %825 = vmatpush3.bf16.msra.mxu0 %v377_v8  ;;  %867 = vmatpush3.bf16.msra.mxu1 %v377_v8 }
  0x29   : > { %827 = vmatmul.mubr.msk.bf16.vlgmr.msra.gmra.mrb[0].mxu0 %vm326_vm0, %v885_v9  ;;  %843 = vmatmul.mubr.msk.bf16.vlgmr.msra.gmra.mrb[0].mxu1 %vm326_vm0, %v893_v11 }
  0x2a   : > { %830 = vmatprep.mubr.msk.bf16.mxu0 %vm326_vm0, %v886_v10  ;;  %846 = vmatprep.mubr.msk.bf16.mxu1 %vm326_vm0, %v894_v12 }
  0x31   : > { %831 = vmatmul.mubr.msk.bf16.gmra.mrb[4].mxu0 %vm326_vm0, %v887_v13  ;;  %847 = vmatmul.mubr.msk.bf16.gmra.mrb[4].mxu1 %vm326_vm0, %v895_v15 }
  0x32   : > { %834 = vmatprep.mubr.msk.bf16.mxu0 %vm326_vm0, %v888_v14  ;;  %850 = vmatprep.mubr.msk.bf16.mxu1 %vm326_vm0, %v896_v16 }
  0x39   : > { %835 = vmatmul.mubr.msk.bf16.gmra.mrb[8].mxu0 %vm326_vm0, %v889_v17  ;;  %851 = vmatmul.mubr.msk.bf16.gmra.mrb[8].mxu1 %vm326_vm0, %v897_v19 }
  0x3a   : > { %838 = vmatprep.mubr.msk.bf16.mxu0 %vm326_vm0, %v890_v18  ;;  %854 = vmatprep.mubr.msk.bf16.mxu1 %vm326_vm0, %v898_v20 }
  0x41   : > { %839 = vmatmul.mubr.msk.bf16.gmra.mrb[12].mxu0 %vm326_vm0, %v891_v21  ;;  %855 = vmatmul.mubr.msk.bf16.gmra.mrb[12].mxu1 %vm326_vm0, %v899_v22 }
  0xfc   : > { %v828_v23 = vpop.f32.mrb[0].mxu0  ;;  %v998_v25 = vpop.f32.mrb[0].mxu1 }
  0xfd   : > { %542 = vst [vmem:[%s945_s22 + $0x10] sm:$0xff] %v828_v23  ;;  %v413_v24 = vpop.f32.mrb[1].mxu0  ;;  %558 = vst [vmem:[%s945_s22 + $0x90] sm:$0xff] %v998_v25  ;;  %v1003_v27 = vpop.f32.mrb[1].mxu1  ;;  %v615_v34 = vmul.f32 %v828_v23, %v828_v23 }
  0xfe   : > { %540 = vst [vmem:[%s945_s22] sm:$0xff] %v413_v24  ;;  %v829_v26 = vpop.f32.mrb[2].mxu0  ;;  %556 = vst [vmem:[%s945_s22 + $0x80] sm:$0xff] %v1003_v27  ;;  %v1008_v29 = vpop.f32.mrb[2].mxu1  ;;  %v613_v30 = vmul.f32 %v413_v24, %v413_v24 }
  0xff   : > { %543 = vst [vmem:[%s945_s22 + $0x18] sm:$0xff] %v829_v26  ;;  %v416_v28 = vpop.f32.mrb[3].mxu0  ;;  %559 = vst [vmem:[%s945_s22 + $0x98] sm:$0xff] %v1008_v29  ;;  %v1013_v33 = vpop.f32.mrb[3].mxu1  ;;  %v616_v37 = vmul.f32 %v829_v26, %v829_v26 }
 0x100   : > { %541 = vst [vmem:[%s945_s22 + $0x8] sm:$0xff] %v416_v28  ;;  %v573_v31 = vadd.f32 %v416_v28, %v413_v24  ;;  %v614_v32 = vmul.f32 %v416_v28, %v416_v28  ;;  %557 = vst [vmem:[%s945_s22 + $0x88] sm:$0xff] %v1013_v33 }
 0x102   : > { %v574_v35 = vadd.f32 %v828_v23, %v573_v31  ;;  %v645_v36 = vadd.f32 %v614_v32, %v613_v30 }
 0x104   : > { %v646_v38 = vadd.f32 %v645_v36, %v615_v34  ;;  %v832_v39 = vpop.f32.mrb[4].mxu0  ;;  %v575_v40 = vadd.f32 %v829_v26, %v574_v35  ;;  %v1018_v42 = vpop.f32.mrb[4].mxu1 }
 0x105   : > { %546 = vst [vmem:[%s945_s22 + $0x30] sm:$0xff] %v832_v39  ;;  %v429_v41 = vpop.f32.mrb[5].mxu0  ;;  %562 = vst [vmem:[%s945_s22 + $0xb0] sm:$0xff] %v1018_v42  ;;  %v1023_v47 = vpop.f32.mrb[5].mxu1  ;;  %v619_v54 = vmul.f32 %v832_v39, %v832_v39 }
 0x106   : > { %544 = vst [vmem:[%s945_s22 + $0x20] sm:$0xff] %v429_v41  ;;  %v576_v43 = vadd.f32 %v575_v40, %v429_v41  ;;  %v617_v44 = vmul.f32 %v429_v41, %v429_v41  ;;  %v647_v45 = vadd.f32 %v646_v38, %v616_v37  ;;  %v833_v46 = vpop.f32.mrb[6].mxu0  ;;  %560 = vst [vmem:[%s945_s22 + $0xa0] sm:$0xff] %v1023_v47  ;;  %v1028_v49 = vpop.f32.mrb[6].mxu1 }
 0x107   : > { %547 = vst [vmem:[%s945_s22 + $0x38] sm:$0xff] %v833_v46  ;;  %v432_v48 = vpop.f32.mrb[7].mxu0  ;;  %563 = vst [vmem:[%s945_s22 + $0xb8] sm:$0xff] %v1028_v49  ;;  %v1033_v53 = vpop.f32.mrb[7].mxu1  ;;  %v620_v57 = vmul.f32 %v833_v46, %v833_v46  ;;  %v629_v40 = vmul.f32 %v1003_v27, %v1003_v27 }
 0x108   : > { %v648_v50 = vadd.f32 %v647_v45, %v617_v44  ;;  %545 = vst [vmem:[%s945_s22 + $0x28] sm:$0xff] %v432_v48  ;;  %v577_v51 = vadd.f32 %v576_v43, %v432_v48  ;;  %v618_v52 = vmul.f32 %v432_v48, %v432_v48  ;;  %561 = vst [vmem:[%s945_s22 + $0xa8] sm:$0xff] %v1033_v53 }
 0x109   : > { %v631_v48 = vmul.f32 %v998_v25, %v998_v25 }
 0x10a   : > { %v578_v55 = vadd.f32 %v832_v39, %v577_v51  ;;  %v649_v56 = vadd.f32 %v648_v50, %v618_v52  ;;  %v632_v52 = vmul.f32 %v1008_v29, %v1008_v29 }
 0x10c   : > { %v650_v58 = vadd.f32 %v649_v56, %v619_v54  ;;  %v836_v59 = vpop.f32.mrb[8].mxu0  ;;  %v579_v60 = vadd.f32 %v833_v46, %v578_v55  ;;  %v1038_v62 = vpop.f32.mrb[8].mxu1  ;;  %v630_v46 = vmul.f32 %v1013_v33, %v1013_v33 }
 0x10d   : > { %550 = vst [vmem:[%s945_s22 + $0x50] sm:$0xff] %v836_v59  ;;  %v445_v61 = vpop.f32.mrb[9].mxu0  ;;  %566 = vst [vmem:[%s945_s22 + $0xd0] sm:$0xff] %v1038_v62  ;;  %v1043_v3 = vpop.f32.mrb[9].mxu1  ;;  %v623_v10 = vmul.f32 %v836_v59, %v836_v59 }
 0x10e   : > { %548 = vst [vmem:[%s945_s22 + $0x40] sm:$0xff] %v445_v61  ;;  %v580_v63 = vadd.f32 %v579_v60, %v445_v61  ;;  %v621_v0 = vmul.f32 %v445_v61, %v445_v61  ;;  %v651_v1 = vadd.f32 %v650_v58, %v620_v57  ;;  %v837_v2 = vpop.f32.mrb[10].mxu0  ;;  %564 = vst [vmem:[%s945_s22 + $0xc0] sm:$0xff] %v1043_v3  ;;  %v1048_v5 = vpop.f32.mrb[10].mxu1 }
 0x10f   : > { %551 = vst [vmem:[%s945_s22 + $0x58] sm:$0xff] %v837_v2  ;;  %v448_v4 = vpop.f32.mrb[11].mxu0  ;;  %567 = vst [vmem:[%s945_s22 + $0xd8] sm:$0xff] %v1048_v5  ;;  %v1053_v9 = vpop.f32.mrb[11].mxu1  ;;  %v624_v13 = vmul.f32 %v837_v2, %v837_v2 }
 0x110   : > { %v652_v6 = vadd.f32 %v651_v1, %v621_v0  ;;  %549 = vst [vmem:[%s945_s22 + $0x48] sm:$0xff] %v448_v4  ;;  %v581_v7 = vadd.f32 %v580_v63, %v448_v4  ;;  %v622_v8 = vmul.f32 %v448_v4, %v448_v4  ;;  %565 = vst [vmem:[%s945_s22 + $0xc8] sm:$0xff] %v1053_v9 }
 0x112   : > { %v582_v11 = vadd.f32 %v836_v59, %v581_v7  ;;  %v653_v12 = vadd.f32 %v652_v6, %v622_v8  ;;  %v634_v59 = vmul.f32 %v1033_v53, %v1033_v53  ;;  %v638_v6 = vmul.f32 %v1053_v9, %v1053_v9 }
 0x114   : > { %v654_v14 = vadd.f32 %v653_v12, %v623_v10  ;;  %v840_v15 = vpop.f32.mrb[12].mxu0  ;;  %v583_v16 = vadd.f32 %v837_v2, %v582_v11  ;;  %v1058_v18 = vpop.f32.mrb[12].mxu1 }
 0x115   : > { %554 = vst [vmem:[%s945_s22 + $0x70] sm:$0xff] %v840_v15  ;;  %v461_v17 = vpop.f32.mrb[13].mxu0  ;;  %570 = vst [vmem:[%s945_s22 + $0xf0] sm:$0xff] %v1058_v18  ;;  %v525_v23 = vpop.f32.mrb[13].mxu1  ;;  %v627_v34 = vmul.f32 %v840_v15, %v840_v15 }
 0x116   : > { %552 = vst [vmem:[%s945_s22 + $0x60] sm:$0xff] %v461_v17  ;;  %v584_v19 = vadd.f32 %v583_v16, %v461_v17  ;;  %v625_v20 = vmul.f32 %v461_v17, %v461_v17  ;;  %v655_v21 = vadd.f32 %v654_v14, %v624_v13  ;;  %v841_v22 = vpop.f32.mrb[14].mxu0  ;;  %568 = vst [vmem:[%s945_s22 + $0xe0] sm:$0xff] %v525_v23  ;;  %v857_v26 = vpop.f32.mrb[14].mxu1 }
 0x117   : > { %555 = vst [vmem:[%s945_s22 + $0x78] sm:$0xff] %v841_v22  ;;  %v464_v24 = vpop.f32.mrb[15].mxu0  ;;  %571 = vst [vmem:[%s945_s22 + $0xf8] sm:$0xff] %v857_v26  ;;  %v528_v32 = vpop.f32.mrb[15].mxu1  ;;  %v628_v37 = vmul.f32 %v841_v22, %v841_v22 }
 0x118   : > { %v656_v28 = vadd.f32 %v655_v21, %v625_v20  ;;  %553 = vst [vmem:[%s945_s22 + $0x68] sm:$0xff] %v464_v24  ;;  %v585_v30 = vadd.f32 %v584_v19, %v464_v24  ;;  %v626_v31 = vmul.f32 %v464_v24, %v464_v24  ;;  %569 = vst [vmem:[%s945_s22 + $0xe8] sm:$0xff] %v528_v32 }
 0x119   : > { %v642_v16 = vmul.f32 %v528_v32, %v528_v32 }
 0x11a   : > { %v586_v35 = vadd.f32 %v840_v15, %v585_v30  ;;  %v657_v36 = vadd.f32 %v656_v28, %v626_v31 }
 0x11c   : > { %v658_v38 = vadd.f32 %v657_v36, %v627_v34  ;;  %v587_v39 = vadd.f32 %v841_v22, %v586_v35 }
 0x11e   : > { %v588_v41 = vadd.f32 %v587_v39, %v1003_v27  ;;  %v659_v43 = vadd.f32 %v658_v38, %v628_v37  ;;  %v633_v27 = vmul.f32 %v1023_v47, %v1023_v47 }
 0x120   : > { %v660_v44 = vadd.f32 %v659_v43, %v629_v40  ;;  %v589_v45 = vadd.f32 %v588_v41, %v1013_v33 }
 0x122   : > { %v590_v50 = vadd.f32 %v998_v25, %v589_v45  ;;  %v661_v51 = vadd.f32 %v660_v44, %v630_v46  ;;  %v635_v25 = vmul.f32 %v1018_v42, %v1018_v42 }
 0x124   : > { %v662_v54 = vadd.f32 %v661_v51, %v631_v48  ;;  %v591_v55 = vadd.f32 %v1008_v29, %v590_v50  ;;  %v636_v29 = vmul.f32 %v1028_v49, %v1028_v49 }
 0x126   : > { %v592_v56 = vadd.f32 %v591_v55, %v1023_v47  ;;  %v663_v57 = vadd.f32 %v662_v54, %v632_v52  ;;  %v637_v47 = vmul.f32 %v1043_v3, %v1043_v3 }
 0x128   : > { %v664_v58 = vadd.f32 %v663_v57, %v633_v27  ;;  %v593_v33 = vadd.f32 %v592_v56, %v1033_v53 }
 0x12a   : > { %v594_v60 = vadd.f32 %v1018_v42, %v593_v33  ;;  %v665_v61 = vadd.f32 %v664_v58, %v634_v59  ;;  %v639_v42 = vmul.f32 %v1038_v62, %v1038_v62 }
 0x12c   : > { %v666_v63 = vadd.f32 %v665_v61, %v635_v25  ;;  %v595_v0 = vadd.f32 %v1028_v49, %v594_v60  ;;  %v640_v49 = vmul.f32 %v1048_v5, %v1048_v5 }
 0x12e   : > { %v596_v1 = vadd.f32 %v595_v0, %v1043_v3  ;;  %v667_v2 = vadd.f32 %v666_v63, %v636_v29  ;;  %v641_v3 = vmul.f32 %v525_v23, %v525_v23 }
 0x130   : > { %v668_v4 = vadd.f32 %v667_v2, %v637_v47  ;;  %v597_v53 = vadd.f32 %v596_v1, %v1053_v9  ;;  %v643_v9 = vmul.f32 %v1058_v18, %v1058_v18 }
 0x132   : > { %v598_v7 = vadd.f32 %v1038_v62, %v597_v53  ;;  %v669_v8 = vadd.f32 %v668_v4, %v638_v6  ;;  %v644_v62 = vmul.f32 %v857_v26, %v857_v26 }
 0x134   : > { %v670_v10 = vadd.f32 %v669_v8, %v639_v42  ;;  %v599_v11 = vadd.f32 %v1048_v5, %v598_v7 }
 0x136   : > { %v600_v12 = vadd.f32 %v599_v11, %v525_v23  ;;  %v671_v13 = vadd.f32 %v670_v10, %v640_v49 }
 0x138   : > { %v672_v14 = vadd.f32 %v671_v13, %v641_v3  ;;  %v601_v15 = vadd.f32 %v600_v12, %v528_v32  ;;  %v572_v32 = vld [vmem:[%s1125_s3] sm:$0x1] }
 0x13a   : > { %v602_v17 = vadd.f32 %v1058_v18, %v601_v15  ;;  %v673_v19 = vadd.f32 %v672_v14, %v642_v16 }
 0x13c   : > { %v603_v20 = vadd.f32 %v857_v26, %v602_v17  ;;  %v674_v21 = vadd.f32 %v673_v19, %v643_v9  ;;  %v612_v26 = vld [vmem:[%s1125_s3 + $0x1] sm:$0x1] }
 0x13e   : > { %v604_v22 = vrot.slane %v603_v20, 4  ;;  %v675_v24 = vadd.f32 %v674_v21, %v644_v62 }
 0x140   : > { %v605_v28 = vadd.f32 %v604_v22, %v603_v20  ;;  %v676_v30 = vrot.slane %v675_v24, 4 }
 0x142   : > { %v606_v5 = vrot.slane %v605_v28, 2  ;;  %v677_v31 = vadd.f32 %v676_v30, %v675_v24 }
 0x144   : > { %v607_v23 = vadd.f32 %v606_v5, %v605_v28  ;;  %v678_v34 = vrot.slane %v677_v31, 2 }
 0x146   : > { %v608_v35 = vrot.slane %v607_v23, 1  ;;  %v679_v36 = vadd.f32 %v678_v34, %v677_v31 }
 0x148   : > { %v609_v37 = vadd.f32 %v608_v35, %v607_v23  ;;  %v680_v18 = vrot.slane %v679_v36, 1 }
 0x14a   : > { %v610_v38 = vadd.f32 %v609_v37, %v572_v32  ;;  %v681_v39 = vadd.f32 %v680_v18, %v679_v36 }
 0x14c   : > { %611 = vst [vmem:[%s1125_s3] sm:$0x1] %v610_v38  ;;  %v682_v40 = vadd.f32 %v681_v39, %v612_v26 }
 0x14e   : > { %683 = vst [vmem:[%s1125_s3 + $0x1] sm:$0x1] %v682_v40 }
 0x14f PF: > { %s14_s12 = sadd.s32 1, %s906_s12  }
 0x150   : > { %p11_p5 = scmp.ge.s32.totalorder %s14_s12, 4  }
 0x152   :  { %13 = sbr.rel (!%p11_p5) target bundleno = 1 (0x1), region = 70 }

// kernel: basic_block.7
= control target key start
LH: loop header
LB: loop body
LE: loop exit
PB: predicated region body
PF: predicated region fallthrough
CT: control target
= control target key end

     0   :  { %s585_s15 = smov 0   ;;  %s786_s0 = inlined_call_operand.vmem [shape: f32[512,128], index: 0, kind: input, shape index: {}]   ;;  %s787_s1 = inlined_call_operand.vmem [shape: f32[512,128], index: 1, kind: input, shape index: {}]   ;;  %s788_s2 = inlined_call_operand.vmem [shape: f32[1,128], index: 2, kind: input, shape index: {}]   ;;  %s789_s3 = inlined_call_operand.vmem [shape: f32[1,128], index: 3, kind: input, shape index: {}]   ;;  %s790_s4 = inlined_call_operand.vmem [shape: f32[512,128], index: 4, kind: output, shape index: {}]  }
   0x1 LB: > { %s529_s16 = sadd.s32 4294967295, %s558_s15   ;;  %p533_p0 = scmp.ge.s32.totalorder %s558_s15, 1  ;;  %s558_s15 = sphi %s585_s15, %s14_s15  }
   0x2   : > { %p174_p1 = scmp.lt.s32.totalorder %s558_s15, 3 }
   0x4   : > { %p175_p2 = pnand %p533_p0, %p174_p1 }
   0x5   : > { %s534_s17 = sshll.u32 (!%p175_p2), %s529_s16, 5  ;;  %v598_v0 = vld [vmem:[%s788_s2] ss:$0 sm:$0xff] (!%p175_p2) }
   0x6   : > { %178 = sbr.rel (%p175_p2) target bundleno = 55 (0x37), region = 36  ;;  %p206_p3 = scmp.lt.s32.totalorder (!%p175_p2), %s534_s17, 63  ;;  %v616_v2 = vld [vmem:[%s789_s3] ss:$0 sm:$0xff] (!%p175_p2) }
   0xd   : > { %s792_s17 = smov (!%p206_p3, %s534_s17), 63 }
   0xe   : > { %s593_s18 = sshll.u32 %s792_s17, 3 }
   0xf   : > { %s604_s23 = scalar_lea.vmem %s786_s0, %s593_s18  ;;  %s610_s26 = scalar_lea.vmem %s787_s1, %s593_s18 }
  0x10   : > { %v223_v1 = vld [vmem:[%s604_s23] sm:$0xff]  ;;  %v224_v3 = vld [vmem:[%s604_s23 + $0x8] sm:$0xff]  ;;  %v225_v7 = vld [vmem:[%s604_s23 + $0x10] sm:$0xff]  ;;  %s646_s5 = scalar_lea.vmem %s790_s4, %s593_s18 }
  0x11   : > { %v262_v4 = vmul.f32 %v598_v0, %v223_v1  ;;  %v333_v5 = vld [vmem:[%s610_s26] sm:$0xff]  ;;  %v263_v6 = vmul.f32 %v598_v0, %v224_v3  ;;  %v334_v8 = vld [vmem:[%s610_s26 + $0x8] sm:$0xff]  ;;  %v264_v9 = vmul.f32 %v598_v0, %v225_v7  ;;  %v226_v10 = vld [vmem:[%s604_s23 + $0x18] sm:$0xff] }
  0x12   : > { %v227_v11 = vld [vmem:[%s604_s23 + $0x20] sm:$0xff]  ;;  %v335_v14 = vld [vmem:[%s610_s26 + $0x10] sm:$0xff]  ;;  %v265_v15 = vmul.f32 %v598_v0, %v226_v10  ;;  %v336_v16 = vld [vmem:[%s610_s26 + $0x18] sm:$0xff] }
  0x13   : > { %v301_v12 = vadd.f32 %v616_v2, %v262_v4  ;;  %v302_v13 = vadd.f32 %v616_v2, %v263_v6  ;;  %v266_v17 = vmul.f32 %v598_v0, %v227_v11  ;;  %v228_v18 = vld [vmem:[%s604_s23 + $0x28] sm:$0xff]  ;;  %v303_v19 = vadd.f32 %v616_v2, %v264_v9  ;;  %v337_v20 = vld [vmem:[%s610_s26 + $0x20] sm:$0xff]  ;;  %v229_v22 = vld [vmem:[%s604_s23 + $0x30] sm:$0xff] }
  0x14   : > { %v267_v21 = vmul.f32 %v598_v0, %v228_v18  ;;  %v230_v23 = vld [vmem:[%s604_s23 + $0x38] sm:$0xff]  ;;  %v304_v26 = vadd.f32 %v616_v2, %v265_v15  ;;  %v338_v28 = vld [vmem:[%s610_s26 + $0x28] sm:$0xff]  ;;  %v268_v31 = vmul.f32 %v598_v0, %v229_v22  ;;  %v231_v33 = vld [vmem:[%s604_s23 + $0x40] sm:$0xff] }
  0x15   : > { %v365_v24 = vadd.f32 %v333_v5, %v301_v12  ;;  %v366_v25 = vadd.f32 %v334_v8, %v302_v13  ;;  %v305_v27 = vadd.f32 %v616_v2, %v266_v17  ;;  %v367_v29 = vadd.f32 %v335_v14, %v303_v19  ;;  %v232_v34 = vld [vmem:[%s604_s23 + $0x48] sm:$0xff]  ;;  %v339_v39 = vld [vmem:[%s610_s26 + $0x30] sm:$0xff]  ;;  %v340_v40 = vld [vmem:[%s610_s26 + $0x38] sm:$0xff] }
  0x16   : > { %v306_v30 = vadd.f32 %v616_v2, %v267_v21  ;;  %v269_v32 = vmul.f32 %v598_v0, %v230_v23  ;;  %v368_v37 = vadd.f32 %v336_v16, %v304_v26  ;;  %v233_v41 = vld [vmem:[%s604_s23 + $0x50] sm:$0xff]  ;;  %v307_v44 = vadd.f32 %v616_v2, %v268_v31  ;;  %v234_v46 = vld [vmem:[%s604_s23 + $0x58] sm:$0xff]  ;;  %v235_v47 = vld [vmem:[%s604_s23 + $0x60] sm:$0xff] }
  0x17   : > { %v397_v35 = vmax.f32 %v365_v24, 0.0  ;;  %v398_v36 = vmax.f32 %v366_v25, 0.0  ;;  %v369_v38 = vadd.f32 %v337_v20, %v305_v27  ;;  %v399_v42 = vmax.f32 %v367_v29, 0.0  ;;  %v236_v52 = vld [vmem:[%s604_s23 + $0x68] sm:$0xff]  ;;  %v341_v56 = vld [vmem:[%s610_s26 + $0x40] sm:$0xff]  ;;  %v343_v61 = vld [vmem:[%s610_s26 + $0x50] sm:$0xff] }
  0x18   : > { %v370_v43 = vadd.f32 %v338_v28, %v306_v30  ;;  %v308_v45 = vadd.f32 %v616_v2, %v269_v32  ;;  %v400_v48 = vmax.f32 %v368_v37, 0.0  ;;  %v270_v50 = vmul.f32 %v598_v0, %v231_v33  ;;  %v342_v57 = vld [vmem:[%s610_s26 + $0x48] sm:$0xff]  ;;  %v237_v1 = vld [vmem:[%s604_s23 + $0x70] sm:$0xff]  ;;  %v238_v3 = vld [vmem:[%s604_s23 + $0x78] sm:$0xff] }
  0x19   : > { %429 = vst [vmem:[%s646_s5] sm:$0xff] %v397_v35  ;;  %430 = vst [vmem:[%s646_s5 + $0x8] sm:$0xff] %v398_v36  ;;  %v401_v49 = vmax.f32 %v369_v38, 0.0  ;;  %v271_v51 = vmul.f32 %v598_v0, %v232_v34  ;;  %v371_v54 = vadd.f32 %v339_v39, %v307_v44  ;;  %v272_v58 = vmul.f32 %v598_v0, %v233_v41  ;;  %v344_v7 = vld [vmem:[%s610_s26 + $0x58] sm:$0xff]  ;;  %v345_v8 = vld [vmem:[%s610_s26 + $0x60] sm:$0xff] }
  0x1a   : > { %431 = vst [vmem:[%s646_s5 + $0x10] sm:$0xff] %v399_v42  ;;  %v402_v53 = vmax.f32 %v370_v43, 0.0  ;;  %v372_v55 = vadd.f32 %v340_v40, %v308_v45  ;;  %432 = vst [vmem:[%s646_s5 + $0x18] sm:$0xff] %v400_v48  ;;  %v309_v59 = vadd.f32 %v616_v2, %v270_v50  ;;  %v273_v62 = vmul.f32 %v598_v0, %v234_v46  ;;  %v346_v14 = vld [vmem:[%s610_s26 + $0x68] sm:$0xff]  ;;  %v239_v19 = vld [vmem:[%s604_s23 + $0x80] sm:$0xff] }
  0x1b   : > { %433 = vst [vmem:[%s646_s5 + $0x20] sm:$0xff] %v401_v49  ;;  %v310_v60 = vadd.f32 %v616_v2, %v271_v51  ;;  %v274_v63 = vmul.f32 %v598_v0, %v235_v47  ;;  %v403_v4 = vmax.f32 %v371_v54, 0.0  ;;  %v311_v6 = vadd.f32 %v616_v2, %v272_v58  ;;  %v240_v20 = vld [vmem:[%s604_s23 + $0x88] sm:$0xff]  ;;  %v347_v25 = vld [vmem:[%s610_s26 + $0x70] sm:$0xff]  ;;  %v348_v26 = vld [vmem:[%s610_s26 + $0x78] sm:$0xff] }
  0x1c   : > { %434 = vst [vmem:[%s646_s5 + $0x28] sm:$0xff] %v402_v53  ;;  %v404_v5 = vmax.f32 %v372_v55, 0.0  ;;  %v275_v9 = vmul.f32 %v598_v0, %v236_v52  ;;  %v373_v10 = vadd.f32 %v341_v56, %v309_v59  ;;  %v312_v12 = vadd.f32 %v616_v2, %v273_v62  ;;  %v241_v27 = vld [vmem:[%s604_s23 + $0x90] sm:$0xff]  ;;  %v242_v32 = vld [vmem:[%s604_s23 + $0x98] sm:$0xff]  ;;  %v243_v33 = vld [vmem:[%s604_s23 + $0xa0] sm:$0xff] }
  0x1d   : > { %v374_v11 = vadd.f32 %v342_v57, %v310_v60  ;;  %v313_v13 = vadd.f32 %v616_v2, %v274_v63  ;;  %435 = vst [vmem:[%s646_s5 + $0x30] sm:$0xff] %v403_v4  ;;  %v375_v15 = vadd.f32 %v343_v61, %v311_v6  ;;  %v276_v17 = vmul.f32 %v598_v0, %v237_v1  ;;  %v244_v38 = vld [vmem:[%s604_s23 + $0xa8] sm:$0xff]  ;;  %v349_v42 = vld [vmem:[%s610_s26 + $0x80] sm:$0xff]  ;;  %v351_v47 = vld [vmem:[%s610_s26 + $0x90] sm:$0xff] }
  0x1e   : > { %436 = vst [vmem:[%s646_s5 + $0x38] sm:$0xff] %v404_v5  ;;  %v314_v16 = vadd.f32 %v616_v2, %v275_v9  ;;  %v277_v18 = vmul.f32 %v598_v0, %v238_v3  ;;  %v405_v21 = vmax.f32 %v373_v10, 0.0  ;;  %v376_v23 = vadd.f32 %v344_v7, %v312_v12  ;;  %v350_v43 = vld [vmem:[%s610_s26 + $0x88] sm:$0xff]  ;;  %v245_v50 = vld [vmem:[%s604_s23 + $0xb0] sm:$0xff]  ;;  %v246_v51 = vld [vmem:[%s604_s23 + $0xb8] sm:$0xff] }
  0x1f   : > { %v406_v22 = vmax.f32 %v374_v11, 0.0  ;;  %v377_v24 = vadd.f32 %v345_v8, %v313_v13  ;;  %v407_v28 = vmax.f32 %v375_v15, 0.0  ;;  %v315_v30 = vadd.f32 %v616_v2, %v276_v17  ;;  %v352_v55 = vld [vmem:[%s610_s26 + $0x98] sm:$0xff]  ;;  %v353_v56 = vld [vmem:[%s610_s26 + $0xa0] sm:$0xff]  ;;  %v354_v62 = vld [vmem:[%s610_s26 + $0xa8] sm:$0xff] }
  0x20   : > { %v378_v29 = vadd.f32 %v346_v14, %v314_v16  ;;  %v316_v31 = vadd.f32 %v616_v2, %v277_v18  ;;  %437 = vst [vmem:[%s646_s5 + $0x40] sm:$0xff] %v405_v21  ;;  %v408_v34 = vmax.f32 %v376_v23, 0.0  ;;  %v278_v36 = vmul.f32 %v598_v0, %v239_v19  ;;  %v247_v5 = vld [vmem:[%s604_s23 + $0xc0] sm:$0xff]  ;;  %v248_v6 = vld [vmem:[%s604_s23 + $0xc8] sm:$0xff]  ;;  %v355_v11 = vld [vmem:[%s610_s26 + $0xb0] sm:$0xff] }
  0x21   : > { %438 = vst [vmem:[%s646_s5 + $0x48] sm:$0xff] %v406_v22  ;;  %v409_v35 = vmax.f32 %v377_v24, 0.0  ;;  %v279_v37 = vmul.f32 %v598_v0, %v240_v20  ;;  %439 = vst [vmem:[%s646_s5 + $0x50] sm:$0xff] %v407_v28  ;;  %v379_v40 = vadd.f32 %v347_v25, %v315_v30  ;;  %v280_v44 = vmul.f32 %v598_v0, %v241_v27  ;;  %v356_v12 = vld [vmem:[%s610_s26 + $0xb8] sm:$0xff]  ;;  %v249_v13 = vld [vmem:[%s604_s23 + $0xd0] sm:$0xff] }
  0x22   : > { %v410_v39 = vmax.f32 %v378_v29, 0.0  ;;  %v380_v41 = vadd.f32 %v348_v26, %v316_v31  ;;  %440 = vst [vmem:[%s646_s5 + $0x58] sm:$0xff] %v408_v34  ;;  %v317_v45 = vadd.f32 %v616_v2, %v278_v36  ;;  %v281_v48 = vmul.f32 %v598_v0, %v242_v32  ;;  %v250_v18 = vld [vmem:[%s604_s23 + $0xd8] sm:$0xff]  ;;  %v251_v19 = vld [vmem:[%s604_s23 + $0xe0] sm:$0xff]  ;;  %v252_v24 = vld [vmem:[%s604_s23 + $0xe8] sm:$0xff] }
  0x23   : > { %441 = vst [vmem:[%s646_s5 + $0x60] sm:$0xff] %v409_v35  ;;  %v318_v46 = vadd.f32 %v616_v2, %v279_v37  ;;  %v282_v49 = vmul.f32 %v598_v0, %v243_v33  ;;  %v411_v52 = vmax.f32 %v379_v40, 0.0  ;;  %v319_v54 = vadd.f32 %v616_v2, %v280_v44  ;;  %v357_v28 = vld [vmem:[%s610_s26 + $0xc0] sm:$0xff]  ;;  %v358_v29 = vld [vmem:[%s610_s26 + $0xc8] sm:$0xff]  ;;  %v359_v33 = vld [vmem:[%s610_s26 + $0xd0] sm:$0xff] }
  0x24   : > { %442 = vst [vmem:[%s646_s5 + $0x68] sm:$0xff] %v410_v39  ;;  %v412_v53 = vmax.f32 %v380_v41, 0.0  ;;  %v283_v57 = vmul.f32 %v598_v0, %v244_v38  ;;  %v381_v58 = vadd.f32 %v349_v42, %v317_v45  ;;  %v320_v60 = vadd.f32 %v616_v2, %v281_v48  ;;  %v253_v36 = vld [vmem:[%s604_s23 + $0xf0] sm:$0xff]  ;;  %v254_v37 = vld [vmem:[%s604_s23 + $0xf8] sm:$0xff]  ;;  %v361_v42 = vld [vmem:[%s610_s26 + $0xe0] sm:$0xff] }
  0x25   : > { %v382_v59 = vadd.f32 %v350_v43, %v318_v46  ;;  %v321_v61 = vadd.f32 %v616_v2, %v282_v49  ;;  %443 = vst [vmem:[%s646_s5 + $0x70] sm:$0xff] %v411_v52  ;;  %v383_v63 = vadd.f32 %v351_v47, %v319_v54  ;;  %v284_v3 = vmul.f32 %v598_v0, %v245_v50  ;;  %v360_v41 = vld [vmem:[%s610_s26 + $0xd8] sm:$0xff]  ;;  %v362_v48 = vld [vmem:[%s610_s26 + $0xe8] sm:$0xff] }
  0x26   : > { %444 = vst [vmem:[%s646_s5 + $0x78] sm:$0xff] %v412_v53  ;;  %v322_v1 = vadd.f32 %v616_v2, %v283_v57  ;;  %v285_v4 = vmul.f32 %v598_v0, %v246_v51  ;;  %v413_v7 = vmax.f32 %v381_v58, 0.0  ;;  %v384_v9 = vadd.f32 %v352_v55, %v320_v60  ;;  %v363_v57 = vld [vmem:[%s610_s26 + $0xf0] sm:$0xff]  ;;  %v364_v58 = vld [vmem:[%s610_s26 + $0xf8] sm:$0xff] }
  0x27   : > { %v414_v8 = vmax.f32 %v382_v59, 0.0  ;;  %v385_v10 = vadd.f32 %v353_v56, %v321_v61  ;;  %v415_v14 = vmax.f32 %v383_v63, 0.0  ;;  %v323_v16 = vadd.f32 %v616_v2, %v284_v3 }
  0x28   : > { %v386_v15 = vadd.f32 %v354_v62, %v322_v1  ;;  %v324_v17 = vadd.f32 %v616_v2, %v285_v4  ;;  %445 = vst [vmem:[%s646_s5 + $0x80] sm:$0xff] %v413_v7  ;;  %v416_v20 = vmax.f32 %v384_v9, 0.0  ;;  %v286_v22 = vmul.f32 %v598_v0, %v247_v5 }
  0x29   : > { %446 = vst [vmem:[%s646_s5 + $0x88] sm:$0xff] %v414_v8  ;;  %v417_v21 = vmax.f32 %v385_v10, 0.0  ;;  %v287_v23 = vmul.f32 %v598_v0, %v248_v6  ;;  %447 = vst [vmem:[%s646_s5 + $0x90] sm:$0xff] %v415_v14  ;;  %v387_v26 = vadd.f32 %v355_v11, %v323_v16  ;;  %v288_v30 = vmul.f32 %v598_v0, %v249_v13 }
  0x2a   : > { %v418_v25 = vmax.f32 %v386_v15, 0.0  ;;  %v388_v27 = vadd.f32 %v356_v12, %v324_v17  ;;  %448 = vst [vmem:[%s646_s5 + $0x98] sm:$0xff] %v416_v20  ;;  %v325_v31 = vadd.f32 %v616_v2, %v286_v22  ;;  %v289_v34 = vmul.f32 %v598_v0, %v250_v18 }
  0x2b   : > { %449 = vst [vmem:[%s646_s5 + $0xa0] sm:$0xff] %v417_v21  ;;  %v326_v32 = vadd.f32 %v616_v2, %v287_v23  ;;  %v290_v35 = vmul.f32 %v598_v0, %v251_v19  ;;  %v419_v38 = vmax.f32 %v387_v26, 0.0  ;;  %v327_v40 = vadd.f32 %v616_v2, %v288_v30 }
  0x2c   : > { %450 = vst [vmem:[%s646_s5 + $0xa8] sm:$0xff] %v418_v25  ;;  %v420_v39 = vmax.f32 %v388_v27, 0.0  ;;  %v291_v43 = vmul.f32 %v598_v0, %v252_v24  ;;  %v389_v44 = vadd.f32 %v357_v28, %v325_v31  ;;  %v328_v46 = vadd.f32 %v616_v2, %v289_v34 }
  0x2d   : > { %v390_v45 = vadd.f32 %v358_v29, %v326_v32  ;;  %v329_v47 = vadd.f32 %v616_v2, %v290_v35  ;;  %451 = vst [vmem:[%s646_s5 + $0xb0] sm:$0xff] %v419_v38  ;;  %v391_v49 = vadd.f32 %v359_v33, %v327_v40  ;;  %v292_v51 = vmul.f32 %v598_v0, %v253_v36 }
  0x2e   : > { %452 = vst [vmem:[%s646_s5 + $0xb8] sm:$0xff] %v420_v39  ;;  %v330_v50 = vadd.f32 %v616_v2, %v291_v43  ;;  %v293_v52 = vmul.f32 %v598_v0, %v254_v37  ;;  %v421_v53 = vmax.f32 %v389_v44, 0.0  ;;  %v392_v55 = vadd.f32 %v360_v41, %v328_v46 }
  0x2f   : > { %v422_v54 = vmax.f32 %v390_v45, 0.0  ;;  %v393_v56 = vadd.f32 %v361_v42, %v329_v47  ;;  %v423_v59 = vmax.f32 %v391_v49, 0.0  ;;  %v331_v61 = vadd.f32 %v616_v2, %v292_v51 }
  0x30   : > { %v394_v60 = vadd.f32 %v362_v48, %v330_v50  ;;  %v332_v62 = vadd.f32 %v616_v2, %v293_v52  ;;  %453 = vst [vmem:[%s646_s5 + $0xc0] sm:$0xff] %v421_v53  ;;  %v424_v0 = vmax.f32 %v392_v55, 0.0 }
  0x31   : > { %454 = vst [vmem:[%s646_s5 + $0xc8] sm:$0xff] %v422_v54  ;;  %v425_v63 = vmax.f32 %v393_v56, 0.0  ;;  %455 = vst [vmem:[%s646_s5 + $0xd0] sm:$0xff] %v423_v59  ;;  %v395_v3 = vadd.f32 %v363_v57, %v331_v61 }
  0x32   : > { %v426_v1 = vmax.f32 %v394_v60, 0.0  ;;  %v396_v4 = vadd.f32 %v364_v58, %v332_v62  ;;  %456 = vst [vmem:[%s646_s5 + $0xd8] sm:$0xff] %v424_v0 }
  0x33   : > { %457 = vst [vmem:[%s646_s5 + $0xe0] sm:$0xff] %v425_v63  ;;  %v427_v5 = vmax.f32 %v395_v3, 0.0 }
  0x34   : > { %458 = vst [vmem:[%s646_s5 + $0xe8] sm:$0xff] %v426_v1  ;;  %v428_v6 = vmax.f32 %v396_v4, 0.0 }
  0x35   : > { %459 = vst [vmem:[%s646_s5 + $0xf0] sm:$0xff] %v427_v5 }
  0x36   : > { %460 = vst [vmem:[%s646_s5 + $0xf8] sm:$0xff] %v428_v6 }
  0x37 PF: > { %s14_s15 = sadd.s32 1, %s558_s15  }
  0x38   : > { %p11_p4 = scmp.ge.s32.totalorder %s14_s15, 4  }
  0x3a   :  { %13 = sbr.rel (!%p11_p4) target bundleno = 1 (0x1), region = 69 }

</bundles_post_ra>
